<compile_context>
chip_gen: v7x
topology: tpu7x:2x2x1
jax: 0.10.0
libtpu: 0.0.40
codegen_flags: <defaults>
</compile_context>

<pallas_src>
import jax
import jax.numpy as jnp
from jax.experimental import pallas as pl
from jax.experimental.pallas import tpu as pltpu


def _round_up(n, m):
    return ((n + m - 1) // m) * m


def _make_adapter_kernel(B_pad, TB, C_in, L, C_out, K, H, O):
    pad = K // 2
    L_conv = L + 2 * pad - K + 1          # conv1d output length (stride 1, padding K//2)
    L_pool = L_conv // 2                  # maxpool(kernel=2, stride=2) drops the odd remainder
    L_cp = _round_up(L_conv, 8)           # conv rows rounded to a sublane multiple (layout-free flatten)
    R = L_cp + K - 1                      # padded-input rows needed to produce L_cp conv rows
    pad_hi = R - pad - L                  # trailing zero rows (>= pad)
    KC_in = K * C_in
    lc2 = 2 * L_pool
    num_steps = B_pad // TB

    def kernel(x_ref, wc_ref, w1_ref, b1_ref, w2_ref, b2_ref, out_ref):
        # ---- Layout work folded into the kernel: NCL -> channels-last + halo zero-pad ----
        # x block is (TB, C_in, L) exactly as PyTorch hands it over.
        x_cl = jnp.transpose(x_ref[...], (0, 2, 1))                       # (TB, L, C_in)
        parts = []
        if pad > 0:
            parts.append(jnp.zeros((TB, pad, C_in), jnp.float32))
        parts.append(x_cl)
        if pad_hi > 0:
            parts.append(jnp.zeros((TB, pad_hi, C_in), jnp.float32))
        xpad = jnp.concatenate(parts, axis=1) if len(parts) > 1 else parts[0]   # (TB, R, C_in)

        # ---- Conv1d as input-side im2col + ONE MXU matmul ----
        # xi[:, l, t*C_in + c] = xpad[:, l + t, c]; rows >= L_conv are junk, sliced away below.
        if K > 1:
            xi = jnp.concatenate([xpad[:, t:t + L_cp, :] for t in range(K)], axis=-1)
        else:
            xi = xpad[:, :L_cp, :]
        acc = jnp.dot(xi.reshape(TB * L_cp, KC_in), wc_ref[...],
                      preferred_element_type=jnp.float32).reshape(TB, L_cp, C_out)
        # (conv bias is folded into b1 on the host: max(a+b, c+b) == max(a,c)+b)

        # ---- MaxPool1d(2,2) + mean over sequence, vectorized ----
        pm = jnp.maximum(acc[:, 0:lc2 - 1, :], acc[:, 1:lc2, :])          # (TB, 2*L_pool-1, C_out)
        pos = jax.lax.broadcasted_iota(jnp.int32, pm.shape, 1)
        feat = jnp.sum(jnp.where((pos & 1) == 0, pm, 0.0), axis=1)        # (TB, C_out)  (sum, not mean)
        # (1/L_pool mean scale is folded into w1 on the host)

        # ---- MLP: Linear -> ReLU -> Linear, batched over TB rows ----
        h = jnp.dot(feat, w1_ref[...], preferred_element_type=jnp.float32) + b1_ref[...]
        h = jnp.maximum(h, 0.0)
        o = jnp.dot(h, w2_ref[...], preferred_element_type=jnp.float32) + b2_ref[...]
        out_ref[...] = o.astype(out_ref.dtype)                            # one (TB, O) slab store

    grid_spec = pltpu.PrefetchScalarGridSpec(
        num_scalar_prefetch=0,
        grid=(num_steps,),
        in_specs=[
            pl.BlockSpec((TB, C_in, L), lambda b: (b, 0, 0)),   # x, native PyTorch NCL layout
            pl.BlockSpec((KC_in, C_out), lambda b: (0, 0)),     # im2col conv weight
            pl.BlockSpec((C_out, H), lambda b: (0, 0)),         # W1^T / L_pool
            pl.BlockSpec((1, H), lambda b: (0, 0)),             # b1 + b_conv @ W1^T
            pl.BlockSpec((H, O), lambda b: (0, 0)),             # W2^T
            pl.BlockSpec((1, O), lambda b: (0, 0)),             # b2
        ],
        out_specs=pl.BlockSpec((TB, O), lambda b: (b, 0)),
    )

    return pl.pallas_call(
        kernel,
        out_shape=jax.ShapeDtypeStruct((B_pad, O), jnp.float32),
        grid_spec=grid_spec,
        compiler_params=pltpu.CompilerParams(dimension_semantics=("arbitrary",)),
    )


def modality_adapter_forward(x, params):
    """x: (B, input_dim, seq_len) float32 (PyTorch NCL). Returns (B, output_dim)."""
    w_conv, b_conv, w1, b1, w2, b2 = (
        params["w_conv"], params["b_conv"],
        params["w1"], params["b1"], params["w2"], params["b2"],
    )
    B, C_in, L = x.shape
    C_out, _, K = w_conv.shape
    H = w1.shape[0]
    O = w2.shape[0]
    pad = K // 2
    L_conv = L + 2 * pad - K + 1
    L_pool = L_conv // 2
    if L_pool < 1:
        raise ValueError("seq_len too short: maxpool(2,2) output is empty (mean undefined).")

    # Single grid step for small/medium batches (v5e/v6e have one TensorCore; extra grid steps
    # only add per-step overhead).  Only tile the batch once it is large enough to pressure
    # VMEM; then TB must be a multiple of 8 so the (TB, O) output block satisfies sublane tiling.
    MAX_TB = 512
    if B <= MAX_TB:
        TB, num_steps = B, 1
    else:
        TB = MAX_TB
        num_steps = -(-B // TB)          # cdiv
    B_pad = TB * num_steps
    x_k = jnp.pad(x, ((0, B_pad - B), (0, 0), (0, 0))) if B_pad != B else x

    # One-time host weight folds:
    #   wc[t*C_in + c, co] = w_conv[co, c, t]          (im2col conv weight, tap-major rows)
    #   w1k = W1^T / L_pool                            (mean scale folded in)
    #   b1k = b1 + b_conv @ W1^T                       (conv bias folded in)
    wc = jnp.transpose(w_conv, (2, 1, 0)).reshape(K * C_in, C_out).astype(jnp.float32)
    w1k = (w1.T / L_pool).astype(jnp.float32)
    b1k = (b1 + b_conv @ w1.T)[None, :].astype(jnp.float32)
    w2k = w2.T.astype(jnp.float32)
    b2k = b2[None, :].astype(jnp.float32)

    call = _make_adapter_kernel(B_pad, TB, C_in, L, C_out, K, H, O)
    out = call(x_k, wc, w1k, b1k, w2k, b2k)            # (B_pad, O)
    return out[:B]


def modality_adapter_reference(x, params):
    """Pure-JAX reference matching the PyTorch module exactly."""
    w_conv, b_conv, w1, b1, w2, b2 = (
        params["w_conv"], params["b_conv"],
        params["w1"], params["b1"], params["w2"], params["b2"],
    )
    K = w_conv.shape[-1]
    pad = K // 2
    y = jax.lax.conv_general_dilated(
        x, w_conv, window_strides=(1,), padding=[(pad, pad)],
        dimension_numbers=("NCH", "OIH", "NCH"),
        precision=jax.lax.Precision.HIGHEST,
    ) + b_conv[None, :, None]
    B, C_out, L_conv = y.shape
    L_pool = L_conv // 2
    y = y[..., : 2 * L_pool].reshape(B, C_out, L_pool, 2).max(axis=-1)
    m = y.mean(axis=-1)
    h = jax.nn.relu(jnp.dot(m, w1.T, precision=jax.lax.Precision.HIGHEST) + b1)
    return jnp.dot(h, w2.T, precision=jax.lax.Precision.HIGHEST) + b2


if __name__ == "__main__":
    # Small shapes consistent with the module's forward signature.
    B, INPUT_DIM, SEQ_LEN = 2, 4, 16
    CONV_OUT, KERNEL_SIZE = 8, 3
    MLP_HIDDEN, OUTPUT_DIM = 32, 16

    key = jax.random.PRNGKey(0)
    ks = jax.random.split(key, 8)

    # Deterministic synthetic parameters (shapes follow nn.Conv1d / nn.Linear).
    params = {
        "w_conv": 0.1 * jax.random.normal(ks[0], (CONV_OUT, INPUT_DIM, KERNEL_SIZE), jnp.float32),
        "b_conv": 0.1 * jax.random.normal(ks[1], (CONV_OUT,), jnp.float32),
        "w1": 0.1 * jax.random.normal(ks[2], (MLP_HIDDEN, CONV_OUT), jnp.float32),
        "b1": 0.1 * jax.random.normal(ks[3], (MLP_HIDDEN,), jnp.float32),
        "w2": 0.1 * jax.random.normal(ks[4], (OUTPUT_DIM, MLP_HIDDEN), jnp.float32),
        "b2": 0.1 * jax.random.normal(ks[5], (OUTPUT_DIM,), jnp.float32),
    }
    x = jax.random.normal(ks[6], (B, INPUT_DIM, SEQ_LEN), jnp.float32)

    out = jax.block_until_ready(modality_adapter_forward(x, params))
    ref = jax.block_until_ready(modality_adapter_reference(x, params))

    assert out.shape == (B, OUTPUT_DIM), out.shape
    assert jnp.allclose(out, ref, atol=1e-4, rtol=1e-4), (out, ref)
    print("KERNEL_OK")
</pallas_src>

<mosaic_0001>
module attributes {stable_mosaic.version = 11 : i64} {
  func.func @kernel(%arg0: i32, %arg1: memref<2x4x16xf32, #tpu.memory_space<vmem>>, %arg2: memref<12x8xf32, #tpu.memory_space<vmem>>, %arg3: memref<8x32xf32, #tpu.memory_space<vmem>>, %arg4: memref<1x32xf32, #tpu.memory_space<vmem>>, %arg5: memref<32x16xf32, #tpu.memory_space<vmem>>, %arg6: memref<1x16xf32, #tpu.memory_space<vmem>>, %arg7: memref<2x16xf32, #tpu.memory_space<vmem>>) attributes {dimension_semantics = [#tpu.dimension_semantics<arbitrary>], iteration_bounds = array<i64: 1>, scalar_prefetch = 0 : i64, scratch_operands = 0 : i64, tpu.core_type = #tpu.core_type<tc>, window_params = [{transform_indices = @transform_0, window_bounds = array<i64: 2, 4, 16>}, {pipeline_mode = #tpu.pipeline_mode<synchronous>, transform_indices = @transform_1, window_bounds = array<i64: 12, 8>}, {pipeline_mode = #tpu.pipeline_mode<synchronous>, transform_indices = @transform_2, window_bounds = array<i64: 8, 32>}, {pipeline_mode = #tpu.pipeline_mode<synchronous>, transform_indices = @transform_3, window_bounds = array<i64: 1, 32>}, {pipeline_mode = #tpu.pipeline_mode<synchronous>, transform_indices = @transform_4, window_bounds = array<i64: 32, 16>}, {pipeline_mode = #tpu.pipeline_mode<synchronous>, transform_indices = @transform_5, window_bounds = array<i64: 1, 16>}, {transform_indices = @transform_6, window_bounds = array<i64: 2, 16>}]} {
    %c0 = arith.constant 0 : index
    %c0_0 = arith.constant 0 : index
    %c0_1 = arith.constant 0 : index
    %0 = vector.load %arg1[%c0, %c0_0, %c0_1] : memref<2x4x16xf32, #tpu.memory_space<vmem>>, vector<2x4x16xf32>
    %1 = tpu.transpose %0, [0, 2, 1] : vector<2x4x16xf32> -> vector<2x16x4xf32>
    %cst = arith.constant 0.000000e+00 : f32
    %2 = vector.broadcast %cst : f32 to vector<2x1x4xf32>
    %cst_2 = arith.constant 0.000000e+00 : f32
    %3 = vector.broadcast %cst_2 : f32 to vector<2x1x4xf32>
    %4 = tpu.concatenate %2, %1, %3 in 1 : vector<2x1x4xf32>, vector<2x16x4xf32>, vector<2x1x4xf32> -> vector<2x18x4xf32>
    %5 = vector.extract_strided_slice %4 {offsets = [0, 0, 0], sizes = [2, 16, 4], strides = [1, 1, 1]} : vector<2x18x4xf32> to vector<2x16x4xf32>
    %6 = vector.extract_strided_slice %4 {offsets = [0, 1, 0], sizes = [2, 16, 4], strides = [1, 1, 1]} : vector<2x18x4xf32> to vector<2x16x4xf32>
    %7 = vector.extract_strided_slice %4 {offsets = [0, 2, 0], sizes = [2, 16, 4], strides = [1, 1, 1]} : vector<2x18x4xf32> to vector<2x16x4xf32>
    %8 = tpu.concatenate %5, %6, %7 in 2 : vector<2x16x4xf32>, vector<2x16x4xf32>, vector<2x16x4xf32> -> vector<2x16x12xf32>
    %9 = vector.shape_cast %8 : vector<2x16x12xf32> to vector<32x12xf32>
    %c0_3 = arith.constant 0 : index
    %c0_4 = arith.constant 0 : index
    %10 = vector.load %arg2[%c0_3, %c0_4] : memref<12x8xf32, #tpu.memory_space<vmem>>, vector<12x8xf32>
    %cst_5 = arith.constant dense<0.000000e+00> : vector<32x8xf32>
    %11 = tpu.matmul %9, %10, %cst_5 {dimension_numbers = #tpu.dot_dimension_numbers<[1], [0], [0], [1], [0, 0, 1, 1], [], []>} : vector<32x12xf32>, vector<12x8xf32>, vector<32x8xf32> -> vector<32x8xf32>
    %12 = vector.shape_cast %11 : vector<32x8xf32> to vector<2x16x8xf32>
    %13 = vector.extract_strided_slice %12 {offsets = [0, 0, 0], sizes = [2, 15, 8], strides = [1, 1, 1]} : vector<2x16x8xf32> to vector<2x15x8xf32>
    %14 = vector.extract_strided_slice %12 {offsets = [0, 1, 0], sizes = [2, 15, 8], strides = [1, 1, 1]} : vector<2x16x8xf32> to vector<2x15x8xf32>
    %15 = arith.maximumf %13, %14 : vector<2x15x8xf32>
    %16 = tpu.iota {dimensions = array<i32: 1>} : vector<2x15x8xi32>
    %c1_i32 = arith.constant 1 : i32
    %17 = vector.broadcast %c1_i32 : i32 to vector<2x15x8xi32>
    %18 = arith.andi %16, %17 : vector<2x15x8xi32>
    %c0_i32 = arith.constant 0 : i32
    %19 = vector.broadcast %c0_i32 : i32 to vector<2x15x8xi32>
    %20 = arith.cmpi eq, %18, %19 : vector<2x15x8xi32>
    %cst_6 = arith.constant 0.000000e+00 : f32
    %21 = vector.broadcast %cst_6 : f32 to vector<2x15x8xf32>
    %22 = arith.select %20, %15, %21 : vector<2x15x8xi1>, vector<2x15x8xf32>
    %cst_7 = arith.constant dense<0.000000e+00> : vector<2x8xf32>
    %23 = vector.multi_reduction <add>, %22, %cst_7 [1] : vector<2x15x8xf32> to vector<2x8xf32>
    %c0_8 = arith.constant 0 : index
    %c0_9 = arith.constant 0 : index
    %24 = vector.load %arg3[%c0_8, %c0_9] : memref<8x32xf32, #tpu.memory_space<vmem>>, vector<8x32xf32>
    %cst_10 = arith.constant dense<0.000000e+00> : vector<2x32xf32>
    %25 = tpu.matmul %23, %24, %cst_10 {dimension_numbers = #tpu.dot_dimension_numbers<[1], [0], [0], [1], [0, 0, 1, 1], [], []>} : vector<2x8xf32>, vector<8x32xf32>, vector<2x32xf32> -> vector<2x32xf32>
    %c0_11 = arith.constant 0 : index
    %c0_12 = arith.constant 0 : index
    %26 = vector.load %arg4[%c0_11, %c0_12] : memref<1x32xf32, #tpu.memory_space<vmem>>, vector<1x32xf32>
    %27 = vector.broadcast %26 : vector<1x32xf32> to vector<2x32xf32>
    %28 = arith.addf %25, %27 : vector<2x32xf32>
    %cst_13 = arith.constant 0.000000e+00 : f32
    %29 = vector.broadcast %cst_13 : f32 to vector<2x32xf32>
    %30 = arith.maximumf %28, %29 : vector<2x32xf32>
    %c0_14 = arith.constant 0 : index
    %c0_15 = arith.constant 0 : index
    %31 = vector.load %arg5[%c0_14, %c0_15] : memref<32x16xf32, #tpu.memory_space<vmem>>, vector<32x16xf32>
    %cst_16 = arith.constant dense<0.000000e+00> : vector<2x16xf32>
    %32 = tpu.matmul %30, %31, %cst_16 {dimension_numbers = #tpu.dot_dimension_numbers<[1], [0], [0], [1], [0, 0, 1, 1], [], []>} : vector<2x32xf32>, vector<32x16xf32>, vector<2x16xf32> -> vector<2x16xf32>
    %c0_17 = arith.constant 0 : index
    %c0_18 = arith.constant 0 : index
    %33 = vector.load %arg6[%c0_17, %c0_18] : memref<1x16xf32, #tpu.memory_space<vmem>>, vector<1x16xf32>
    %34 = vector.broadcast %33 : vector<1x16xf32> to vector<2x16xf32>
    %35 = arith.addf %32, %34 : vector<2x16xf32>
    %c0_19 = arith.constant 0 : index
    %c0_20 = arith.constant 0 : index
    %36 = vector.load %arg7[%c0_19, %c0_20] : memref<2x16xf32, #tpu.memory_space<vmem>>, vector<2x16xf32>
    tpu.vector_store %arg7[%c0_19, %c0_20], %35 {strides = array<i32>} : memref<2x16xf32, #tpu.memory_space<vmem>>, vector<2x16xf32>,
    return
  }
  func.func @transform_0(%arg0: i32) -> (i32, i32, i32) {
    %c0_i32 = arith.constant 0 : i32
    %c0_i32_0 = arith.constant 0 : i32
    %c0_i32_1 = arith.constant 0 : i32
    return %arg0, %c0_i32, %c0_i32_0 : i32, i32, i32
  }
  func.func @transform_1(%arg0: i32) -> (i32, i32) {
    %c0_i32 = arith.constant 0 : i32
    %c0_i32_0 = arith.constant 0 : i32
    %c0_i32_1 = arith.constant 0 : i32
    return %c0_i32, %c0_i32_0 : i32, i32
  }
  func.func @transform_2(%arg0: i32) -> (i32, i32) {
    %c0_i32 = arith.constant 0 : i32
    %c0_i32_0 = arith.constant 0 : i32
    %c0_i32_1 = arith.constant 0 : i32
    return %c0_i32, %c0_i32_0 : i32, i32
  }
  func.func @transform_3(%arg0: i32) -> (i32, i32) {
    %c0_i32 = arith.constant 0 : i32
    %c0_i32_0 = arith.constant 0 : i32
    %c0_i32_1 = arith.constant 0 : i32
    return %c0_i32, %c0_i32_0 : i32, i32
  }
  func.func @transform_4(%arg0: i32) -> (i32, i32) {
    %c0_i32 = arith.constant 0 : i32
    %c0_i32_0 = arith.constant 0 : i32
    %c0_i32_1 = arith.constant 0 : i32
    return %c0_i32, %c0_i32_0 : i32, i32
  }
  func.func @transform_5(%arg0: i32) -> (i32, i32) {
    %c0_i32 = arith.constant 0 : i32
    %c0_i32_0 = arith.constant 0 : i32
    %c0_i32_1 = arith.constant 0 : i32
    return %c0_i32, %c0_i32_0 : i32, i32
  }
  func.func @transform_6(%arg0: i32) -> (i32, i32) {
    %c0_i32 = arith.constant 0 : i32
    %c0_i32_0 = arith.constant 0 : i32
    return %arg0, %c0_i32 : i32, i32
  }
}

</mosaic_0001>

<bundles_post_ra>
// kernel: tpu_custom_call.1
= control target key start
LH: loop header
LB: loop body
LE: loop exit
PB: predicated region body
PF: predicated region fallthrough
CT: control target
= control target key end

     0   :  { %s738_s0 = inlined_call_operand.vmem [shape: f32[2,4,16], index: 0, kind: input, shape index: {}]   ;;  %s739_s1 = inlined_call_operand.vmem [shape: f32[12,8], index: 1, kind: input, shape index: {}]   ;;  %s740_s2 = inlined_call_operand.vmem [shape: f32[8,32], index: 2, kind: input, shape index: {}]   ;;  %s741_s3 = inlined_call_operand.vmem [shape: f32[1,32], index: 3, kind: input, shape index: {}]   ;;  %s742_s4 = inlined_call_operand.vmem [shape: f32[32,16], index: 4, kind: input, shape index: {}]   ;;  %s743_s5 = inlined_call_operand.vmem [shape: f32[1,16], index: 5, kind: input, shape index: {}]   ;;  %s744_s6 = inlined_call_operand.hbm [shape: f32[2,16], index: 6, kind: output, shape index: {}]  }
   0x1   :  { %v24_v0 = vld [vmem:[%s738_s0] sm:$0xf] }
   0x2   :  { %26 = vxpose.xlu0.b32.start.end [1/1] (short) (narrow) %v24_v0, 16 }
   0x3   :  { %11 = vsyncpa [#allocation3], 0  ;;  %v25_v1 = vld [vmem:[%s738_s0 + $0x4] sm:$0xf]  ;;  %v172_v5 = vld [vmem:[%s739_s1 + $0x8] sm:$0xf]  ;;  %v293_v58 = vlaneseq }
   0x4   :  { %v171_v4 = vld [vmem:[%s739_s1] sm:$0xff]  ;;  %vm94_vm0 = vcmask 1040384   ;;  %vm186_vm1 = vcmask 1043456   ;;  %vm600_vm2 = vmmov 1   ;;  %vm138_vm4 = vcmask 1045504   ;;  %s601_s0 = smov 8  }
   0x5   :  { %v557_v6 = vpack.c.bf16 %v172_v5, %v171_v4  ;;  %vm558_vm3 = vmpackc.low %vm186_vm1, %vm600_vm2  ;;  %vm115_vm5 = vcmask 1046528   ;;  %s602_s1 = smov 4   ;;  %vm161_vm6 = vcmask 31744   ;;  %vm166_vm7 = vcmask 64512   ;;  %v323_v55 = vld [vmem:[%s740_s2] sm:$0xff]  ;;  %s606_s18 = smov [#allocation2]  }
   0x6   :  { %vm173_vm8 = vcmask 97280   ;;  %v603_v56 = vmov 0.0   ;;  %vm604_vm9 = vmmov 0   ;;  %v605_v57 = vmov 0.0|0.0   ;;  %s501_s19 = sshll.u32 %s606_s18, 4  ;;  %s502_s19 = int_to_ptr.vmem [resolvable:$true] %s501_s19 }
   0x7   :  { %58 = vxpose.xlu0.b32.start.end [1/1] (short) (narrow) %v25_v1, 16  ;;  %559 = vmatprep.subr.msk.bf16.mxu0 %vm558_vm3, %v557_v6  ;;  %v294_v59 = vshrl.u32 %v293_v58, 7  ;;  %vm305_vm12 = vcmask 63488   ;;  %vm333_vm13 = vcmask 1041409   ;;  %vm419_vm14 = vcmask 261120   ;;  %p581_p1 = scmp.lt.s32.totalorder %s502_s19, %s502_s19 }
   0x8   :  { %562 = vmatpush3.bf16.msk.msra.mxu0 %vm558_vm3, %v557_v6  ;;  %541 = vmatprep.subr.mxu1 %v603_v56  ;;  %vm493_vm15 = vcmask 123904  }
   0x9   :  { %543 = vmatprep.mubr.msk.f32.mxu1 %vm604_vm9, %v603_v56  ;;  %542 = vmatpush3.msra.mxu1 %v323_v55  ;;  %v295_v60 = vadd.s32 8, %v294_v59  ;;  %v296_v63 = vand.u32 1, %v294_v59 }
   0xa   :  { %563 = vmatprep.subr.bf16.mxu1 %v605_v57 }
   0xb   :  { %v297_v61 = vand.u32 1, %v295_v60  ;;  %vm689_vm11 = vcmp.eq.s32.totalorder %v296_v63, 0 }
   0xd   :  { %vm684_vm10 = vcmp.eq.s32.totalorder %v297_v61, 0 }
  0x82   :  { %v42_v2 = vpop.trf.xlu0 }
  0x83   :  { %v95_v3 = vrot.slane %v42_v2, 7 }
  0x85   :  { %v107_v8 = vsel %vm94_vm0, 0.0, %v95_v3 }
  0x86   :  { %v43_v7 = vpop.trf.xlu0  ;;  %v116_v12 = vrot.slane %v107_v8, 1  ;;  %v139_v26 = vrot.slane %v107_v8, 2 }
  0x87   :  { %v96_v9 = vrot.slane %v43_v7, 7 }
  0x89   :  { %v97_v10 = vsel %vm94_vm0, %v95_v3, %v96_v9  ;;  %v109_v11 = vsel %vm94_vm0, %v96_v9, 0.0 }
  0x8a   :  { %v142_v13 = vrot.slane %v109_v11, 2  ;;  %v74_v14 = vpop.trf.xlu0  ;;  %v140_v15 = vrot.slane %v97_v10, 2  ;;  %v117_v16 = vrot.slane %v97_v10, 1  ;;  %v119_v17 = vrot.slane %v109_v11, 1 }
  0x8b   :  { %v98_v20 = vrot.slane %v74_v14, 7 }
  0x8c   :  { %v143_v18 = vsel %vm138_vm4, %v140_v15, %v142_v13  ;;  %v118_v19 = vsel %vm115_vm5, %v116_v12, %v117_v16  ;;  %v120_v23 = vsel %vm115_vm5, %v117_v16, %v119_v17  ;;  %v141_v28 = vsel %vm138_vm4, %v139_v26, %v140_v15 }
  0x8d   :  { %151 = vrot.lane.b32.xlu0 %v143_v18, %s601_s0  ;;  %126 = vrot.lane.b32.xlu1 %v118_v19, %s602_s1  ;;  %v108_v24 = vsel %vm94_vm0, 0.0, %v98_v20 }
  0x8e   :  { %v75_v21 = vpop.trf.xlu0  ;;  %v121_v27 = vrot.slane %v108_v24, 1  ;;  %v144_v33 = vrot.slane %v108_v24, 2 }
  0x8f   :  { %v99_v22 = vrot.slane %v75_v21, 7 }
  0x91   :  { %v100_v25 = vsel %vm94_vm0, %v98_v20, %v99_v22  ;;  %128 = vrot.lane.b32.xlu1 %v120_v23, %s602_s1  ;;  %v110_v30 = vsel %vm94_vm0, %v99_v22, 0.0 }
  0x92   :  { %v122_v29 = vrot.slane %v100_v25, 1  ;;  %v124_v31 = vrot.slane %v110_v30, 1  ;;  %v145_v35 = vrot.slane %v100_v25, 2  ;;  %v147_v36 = vrot.slane %v110_v30, 2 }
  0x94   :  { %v123_v32 = vsel %vm115_vm5, %v121_v27, %v122_v29  ;;  %v125_v34 = vsel %vm115_vm5, %v122_v29, %v124_v31  ;;  %v146_v37 = vsel %vm138_vm4, %v144_v33, %v145_v35  ;;  %v148_v38 = vsel %vm138_vm4, %v145_v35, %v147_v36  ;;  %v409_v35 = vld [vmem:[%s742_s4 + $0x8] sm:$0xff] }
  0x95   :  { %149 = vrot.lane.b32.xlu1 %v141_v28, %s601_s0 }
  0x99   :  { %130 = vrot.lane.b32.xlu1 %v123_v32, %s602_s1 }
  0x9d   :  { %132 = vrot.lane.b32.xlu1 %v125_v34, %s602_s1  ;;  %v408_v34 = vld [vmem:[%s742_s4] sm:$0xff] }
  0xa1   :  { %153 = vrot.lane.b32.xlu1 %v146_v37, %s601_s0 }
  0xa5   :  { %155 = vrot.lane.b32.xlu1 %v148_v38, %s601_s0 }
  0xff   :  { %v127_v39 = vpop.permute.xlu1 %126  ;;  %v152_v44 = vpop.permute.xlu0 %151 }
 0x100   :  { %v162_v42 = vsel %vm161_vm6, %v107_v8, %v127_v39  ;;  %v564_v39 = vpack.c.bf16 %v409_v35, %v408_v34 }
 0x103   :  { %v129_v40 = vpop.permute.xlu1 %128 }
 0x104   :  { %v163_v41 = vsel %vm161_vm6, %v97_v10, %v129_v40 }
 0x105   :  { %v168_v46 = vsel %vm166_vm7, %v163_v41, %v152_v44  ;;  %v410_v41 = vld [vmem:[%s742_s4 + $0x10] sm:$0xff]  ;;  %v514_v44 = vld [vmem:[%s741_s3] ss:$0 sm:$0xff] }
 0x107   :  { %v150_v43 = vpop.permute.xlu1 %149 }
 0x108   :  { %v167_v45 = vsel %vm166_vm7, %v162_v42, %v150_v43  ;;  %v411_v42 = vld [vmem:[%s742_s4 + $0x18] sm:$0xff]  ;;  %s576_s4 = scalar_lea.vmem %s502_s19, 32 }
 0x109   :  { %535 = vmatprep.mubr.msk.f32.mxu0 %vm173_vm8, %v167_v45  ;;  %v567_v43 = vpack.c.bf16 %v411_v42, %v410_v41  ;;  %p577_p0 = scmp.ne.s32.totalorder %s502_s19, %s576_s4  ;;  %p582_p2 = scmp.lt.s32.totalorder %s576_s4, %s576_s4 }
 0x10a   :  { %536 = vmatmul.mubr.msk.f32.vlgmr.msra.gmra.mrb[0].mxu0 %vm173_vm8, %v168_v46 }
 0x10b   :  { %v131_v47 = vpop.permute.xlu1 %130  ;;  %p583_p3 = por %p582_p2, %p581_p1 }
 0x10c   :  { %v164_v49 = vsel %vm161_vm6, %v108_v24, %v131_v47 }
 0x10d   :  { %p584_p4 = pnand %p583_p3, %p577_p0 }
 0x10f   :  { %v133_v48 = vpop.permute.xlu1 %132 }
 0x110   :  { %v165_v52 = vsel %vm161_vm6, %v100_v25, %v133_v48 }
 0x113   :  { %v154_v50 = vpop.permute.xlu1 %153 }
 0x114   :  { %v169_v51 = vsel %vm166_vm7, %v164_v49, %v154_v50  ;;  %v516_v49 = vld [vmem:[%s743_s5] ss:$0 sm:$0xff] }
 0x115   :  { %538 = vmatprep.mubr.msk.f32.mxu0 %vm173_vm8, %v169_v51 }
 0x117   :  { %v156_v53 = vpop.permute.xlu1 %155 }
 0x118   :  { %v170_v54 = vsel %vm166_vm7, %v165_v52, %v156_v53 }
 0x119   :  { %539 = vmatmul.mubr.msk.f32.gmra.mrb[2].mxu0 %vm173_vm8, %v170_v54 }
 0x1dd   :  { %v537_v62 = vpop.f32.mrb[0].mxu0 }
 0x1de   :  { %v280_v0 = vrot.slane %v537_v62, 1  ;;  %v256_v1 = vpop.f32.mrb[1].mxu0 }
 0x1df   :  { %v279_v3 = vrot.slane %v256_v1, 1 }
 0x1e0   :  { %v290_v4 = vmax.f32 %v537_v62, %v280_v0 }
 0x1e1   :  { %v281_v5 = vsel %vm115_vm5, %v279_v3, %v280_v0 }
 0x1e2   :  { %v301_v7 = vsel %vm684_vm10, %v290_v4, 0.0  ;;  %v289_v8 = vmax.f32 %v256_v1, %v281_v5 }
 0x1e3   :  { %v306_v10 = vsel %vm305_vm12, %v301_v7, 0.0 }
 0x1e4   :  { %v300_v9 = vsel %vm689_vm11, %v289_v8, 0.0 }
 0x1e5   :  { %v304_v11 = vsel %vm166_vm7, %v300_v9, 0.0 }
 0x1e6   :  { %v307_v12 = vadd.f32 %v306_v10, %v304_v11 }
 0x1e8   :  { %v308_v16 = vrot.slane %v307_v12, 4 }
 0x1ea   :  { %v309_v22 = vadd.f32 %v308_v16, %v307_v12 }
 0x1ec   :  { %v540_v13 = vpop.f32.mrb[2].mxu0  ;;  %v310_v26 = vrot.slane %v309_v22, 2 }
 0x1ed   :  { %v283_v14 = vrot.slane %v540_v13, 1  ;;  %v266_v15 = vpop.f32.mrb[3].mxu0 }
 0x1ee   :  { %v282_v17 = vrot.slane %v266_v15, 1  ;;  %v311_v30 = vadd.f32 %v310_v26, %v309_v22 }
 0x1ef   :  { %v292_v18 = vmax.f32 %v540_v13, %v283_v14 }
 0x1f0   :  { %v284_v19 = vsel %vm115_vm5, %v282_v17, %v283_v14  ;;  %v312_v33 = vrot.slane %v311_v30, 1 }
 0x1f1   :  { %v303_v20 = vsel %vm684_vm10, %v292_v18, 0.0  ;;  %v291_v21 = vmax.f32 %v266_v15, %v284_v19 }
 0x1f2   :  { %v315_v24 = vsel %vm305_vm12, %v303_v20, 0.0  ;;  %v313_v37 = vadd.f32 %v312_v33, %v311_v30 }
 0x1f3   :  { %v302_v23 = vsel %vm689_vm11, %v291_v21, 0.0 }
 0x1f4   :  { %v314_v25 = vsel %vm166_vm7, %v302_v23, 0.0 }
 0x1f5   :  { %v316_v27 = vadd.f32 %v315_v24, %v314_v25 }
 0x1f7   :  { %v317_v28 = vrot.slane %v316_v27, 4 }
 0x1f9   :  { %v318_v29 = vadd.f32 %v317_v28, %v316_v27 }
 0x1fb   :  { %v319_v31 = vrot.slane %v318_v29, 2 }
 0x1fd   :  { %v320_v32 = vadd.f32 %v319_v31, %v318_v29 }
 0x1ff   :  { %v321_v36 = vrot.slane %v320_v32, 1 }
 0x201   :  { %v322_v38 = vadd.f32 %v321_v36, %v320_v32 }
 0x203   :  { %v334_v40 = vsel %vm333_vm13, %v322_v38, %v313_v37 }
 0x204   :  { %544 = vmatmul.mubr.msk.f32.vlgmr.msra.gmra.mrb[0].mxu1 %vm166_vm7, %v334_v40 }
 0x205   :  { %565 = vmatpush3.bf16.msra.mxu1 %v564_v39  ;;  %554 = vmatprep.mubr.msk.f32.mxu1 %vm604_vm9, %v603_v56 }
 0x206   :  { %566 = vmatprep.subr.bf16.mxu1 %v605_v57 }
 0x209   :  { %568 = vmatpush3.bf16.msra.mxu1 %v567_v43 }
 0x2d7   :  { %v403_v45 = vpop.f32.mrb[0].mxu1 }
 0x2d8   :  { %v404_v46 = vadd.f32 %v514_v44, %v403_v45  ;;  %v545_v47 = vpop.f32.mrb[1].mxu1 }
 0x2da   :  { %v407_v48 = vmax.f32 %v404_v46, 0.0 }
 0x2dc   :  { %555 = vmatmul.mubr.msk.f32.vlgmr.msra.gmra.mrb[2].mxu1 %vm419_vm14, %v407_v48 }
 0x3af   :  { %v489_v50 = vpop.f32.mrb[2].mxu1 }
 0x3b0   :  { %v490_v51 = vadd.f32 %v516_v49, %v489_v50  ;;  %v556_v52 = vpop.f32.mrb[3].mxu1 }
 0x3b2   :  { %494 = vst.msk [vmem:[#allocation2] sm:$0x3] %vm493_vm15, %v490_v51 }
 0x3b3   :  { %587 = shalt.err (!%p584_p4)
}
 0x3b4   :  { %s588_s21 = scalar_lea.hbm %s744_s6, 32 }
 0x3b5   :  { %p589_p5 = scmp.ne.s32.totalorder %s744_s6, %s588_s21  ;;  %p592_p6 = scmp.lt.u32.totalorder %s588_s21, %s744_s6 }
 0x3b7   :  { %p594_p7 = pnand %p592_p6, %p589_p5 }
 0x3b9   :  { %597 = shalt.err (!%p594_p7)
}
 0x3ba   :  { %504 = dma.vmem_to_hbm [thread:$0]  %s502_s19, 32, %s744_s6, [#allocation3]  }
 0x3bb   :  { %598 = dma.done.wait [#allocation3], 32  }
 0x3bc   :  { %599 = vsyncadd [#allocation3], 4294967264 }
 0x3bd   :  { %508 = vsyncpa [#allocation3], 1 }

</bundles_post_ra>
